<compile_context>
chip_gen: v5e
topology: v5e:2x2
jax: 0.10.0
libtpu: 0.0.40
codegen_flags: <defaults>
</compile_context>

<pallas_src>
import functools

import jax
import jax.numpy as jnp
from jax.experimental import pallas as pl
from jax.experimental.pallas import tpu as pltpu


def _round_up(x, m):
    return ((x + m - 1) // m) * m


def _attn_gated_kernel(x_ref, wab_ref, bab_ref, wc_ref, bc_ref, out_ref):
    x = x_ref[...]                                            # (TN, L)

    # Fused gate projections: one (TN, L) @ (L, 2D) MXU pass.
    ab = jnp.dot(x, wab_ref[...], preferred_element_type=jnp.float32)
    ab = ab + bab_ref[...]                                    # (TN, 2D)

    D = wab_ref.shape[1] // 2
    a = jnp.tanh(ab[:, :D])                                   # attention_a
    b = jax.nn.sigmoid(ab[:, D:])                             # attention_b
    gated = a * b                                             # (TN, D)

    # attention_c: (TN, D) @ (D, C_pad); C padded to a lane-dense width.
    out = jnp.dot(gated, wc_ref[...], preferred_element_type=jnp.float32)
    out_ref[...] = (out + bc_ref[...]).astype(out_ref.dtype)  # (TN, C_pad)


@functools.partial(jax.jit, static_argnames=("tn",))
def attn_net_gated_forward(x, params, *, tn=512):
    """Returns (A, x) exactly like Attn_Net_Gated.forward (dropout off)."""
    wa, ba, wb, bb, wc, bc = (params["wa"], params["ba"], params["wb"],
                              params["bb"], params["wc"], params["bc"])
    N, L = x.shape
    D = wa.shape[1]
    C = wc.shape[1]

    # ---- wrapper-side packaging (all static / cheap) -----------------------
    # Fuse the two gate projections into one (L, 2D) weight + (1, 2D) bias.
    wab = jnp.concatenate([wa, wb], axis=1)                   # (L, 2D)
    bab = jnp.concatenate([ba, bb], axis=1)                   # (1, 2D)

    # Pad n_classes up to a lane-dense width so stores are unmasked.
    C_pad = _round_up(C, 128)
    wc_p = jnp.zeros((D, C_pad), wc.dtype).at[:, :C].set(wc)
    bc_p = jnp.zeros((1, C_pad), bc.dtype).at[:, :C].set(bc)

    # Tile N; pad rows up to a multiple of the tile (sliced off afterwards).
    TN = min(tn, _round_up(N, 8))
    N_pad = _round_up(N, TN)
    x_p = x if N_pad == N else jnp.pad(x, ((0, N_pad - N), (0, 0)))

    grid = (pl.cdiv(N_pad, TN),)

    cost = pl.CostEstimate(
        flops=2 * N_pad * L * (2 * D) + 2 * N_pad * D * C_pad + N_pad * D,
        transcendentals=2 * N_pad * D,
        bytes_accessed=(x_p.size + wab.size + bab.size + wc_p.size + bc_p.size
                        + N_pad * C_pad) * 4,
    )

    A_pad = pl.pallas_call(
        _attn_gated_kernel,
        out_shape=jax.ShapeDtypeStruct((N_pad, C_pad), x.dtype),
        grid_spec=pltpu.PrefetchScalarGridSpec(
            num_scalar_prefetch=0,
            grid=grid,
            in_specs=[
                pl.BlockSpec((TN, L), lambda i: (i, 0)),      # x tile (streamed)
                pl.BlockSpec((L, 2 * D), lambda i: (0, 0)),   # fused Wa|Wb (resident)
                pl.BlockSpec((1, 2 * D), lambda i: (0, 0)),   # fused ba|bb (resident)
                pl.BlockSpec((D, C_pad), lambda i: (0, 0)),   # Wc padded (resident)
                pl.BlockSpec((1, C_pad), lambda i: (0, 0)),   # bc padded (resident)
            ],
            out_specs=pl.BlockSpec((TN, C_pad), lambda i: (i, 0)),
        ),
        compiler_params=pltpu.CompilerParams(
            dimension_semantics=("parallel",),
        ),
        cost_estimate=cost,
    )(x_p, wab, bab, wc_p, bc_p)

    A = A_pad[:N, :C]
    return A, x


def init_params(key, L, D, n_classes, dtype=jnp.float32):
    """Deterministic synthetic parameters (shapes match the nn.Linear layers)."""
    ks = jax.random.split(key, 6)
    scale_l = 1.0 / jnp.sqrt(L)
    scale_d = 1.0 / jnp.sqrt(D)
    return {
        "wa": jax.random.normal(ks[0], (L, D), dtype) * scale_l,
        "ba": jax.random.normal(ks[1], (1, D), dtype) * scale_l,
        "wb": jax.random.normal(ks[2], (L, D), dtype) * scale_l,
        "bb": jax.random.normal(ks[3], (1, D), dtype) * scale_l,
        "wc": jax.random.normal(ks[4], (D, n_classes), dtype) * scale_d,
        "bc": jax.random.normal(ks[5], (1, n_classes), dtype) * scale_d,
    }


if __name__ == "__main__":
    # Small shapes consistent with the module (L=1024, D=256, n_classes=1
    # defaults, scaled down): N tokens of dim L -> D -> n_classes.
    # TODO(synk): nn.Dropout(0.25) (dropout=True, train mode only) not
    # implemented; default forward (dropout=False / eval) is exact.
    N, L, D, n_classes = 32, 256, 128, 1

    key = jax.random.PRNGKey(0)
    kx, kp = jax.random.split(key)
    x = jax.random.normal(kx, (N, L), jnp.float32)
    params = init_params(kp, L, D, n_classes)

    A, x_out = attn_net_gated_forward(x, params)
    jax.block_until_ready((A, x_out))

    # Reference check in plain JAX (same math as the PyTorch module).
    a_ref = jnp.tanh(x @ params["wa"] + params["ba"])
    b_ref = jax.nn.sigmoid(x @ params["wb"] + params["bb"])
    A_ref = (a_ref * b_ref) @ params["wc"] + params["bc"]

    assert A.shape == (N, n_classes)
    assert x_out.shape == (N, L)
    assert jnp.allclose(A, A_ref, atol=1e-5, rtol=1e-5)
    assert jnp.array_equal(x_out, x)

    print("KERNEL_OK")
</pallas_src>

<mosaic_0001>
module attributes {stable_mosaic.version = 11 : i64} {
  func.func @_attn_gated_kernel(%arg0: i32, %arg1: memref<32x256xf32, #tpu.memory_space<vmem>>, %arg2: memref<256x256xf32, #tpu.memory_space<vmem>>, %arg3: memref<1x256xf32, #tpu.memory_space<vmem>>, %arg4: memref<128x128xf32, #tpu.memory_space<vmem>>, %arg5: memref<1x128xf32, #tpu.memory_space<vmem>>, %arg6: memref<32x128xf32, #tpu.memory_space<vmem>>) attributes {dimension_semantics = [#tpu.dimension_semantics<parallel>], iteration_bounds = array<i64: 1>, scalar_prefetch = 0 : i64, scratch_operands = 0 : i64, tpu.core_type = #tpu.core_type<tc>, window_params = [{transform_indices = @transform_0, window_bounds = array<i64: 32, 256>}, {pipeline_mode = #tpu.pipeline_mode<synchronous>, transform_indices = @transform_1, window_bounds = array<i64: 256, 256>}, {pipeline_mode = #tpu.pipeline_mode<synchronous>, transform_indices = @transform_2, window_bounds = array<i64: 1, 256>}, {pipeline_mode = #tpu.pipeline_mode<synchronous>, transform_indices = @transform_3, window_bounds = array<i64: 128, 128>}, {pipeline_mode = #tpu.pipeline_mode<synchronous>, transform_indices = @transform_4, window_bounds = array<i64: 1, 128>}, {transform_indices = @transform_5, window_bounds = array<i64: 32, 128>}]} {
    %c0 = arith.constant 0 : index
    %c0_0 = arith.constant 0 : index
    %0 = vector.load %arg1[%c0, %c0_0] : memref<32x256xf32, #tpu.memory_space<vmem>>, vector<32x256xf32>
    %c0_1 = arith.constant 0 : index
    %c0_2 = arith.constant 0 : index
    %1 = vector.load %arg2[%c0_1, %c0_2] : memref<256x256xf32, #tpu.memory_space<vmem>>, vector<256x256xf32>
    %cst = arith.constant dense<0.000000e+00> : vector<32x256xf32>
    %2 = tpu.matmul %0, %1, %cst {dimension_numbers = #tpu.dot_dimension_numbers<[1], [0], [0], [1], [0, 0, 1, 1], [], []>} : vector<32x256xf32>, vector<256x256xf32>, vector<32x256xf32> -> vector<32x256xf32>
    %c0_3 = arith.constant 0 : index
    %c0_4 = arith.constant 0 : index
    %3 = vector.load %arg3[%c0_3, %c0_4] : memref<1x256xf32, #tpu.memory_space<vmem>>, vector<1x256xf32>
    %4 = vector.broadcast %3 : vector<1x256xf32> to vector<32x256xf32>
    %5 = arith.addf %2, %4 : vector<32x256xf32>
    %6 = vector.extract_strided_slice %5 {offsets = [0, 0], sizes = [32, 128], strides = [1, 1]} : vector<32x256xf32> to vector<32x128xf32>
    %7 = math.tanh %6 : vector<32x128xf32>
    %8 = vector.extract_strided_slice %5 {offsets = [0, 128], sizes = [32, 128], strides = [1, 1]} : vector<32x256xf32> to vector<32x128xf32>
    %9 = arith.negf %8 : vector<32x128xf32>
    %10 = math.exp %9 : vector<32x128xf32>
    %cst_5 = arith.constant 1.000000e+00 : f32
    %11 = vector.broadcast %cst_5 : f32 to vector<32x128xf32>
    %12 = arith.addf %11, %10 : vector<32x128xf32>
    %13 = arith.divf %11, %12 : vector<32x128xf32>
    %14 = arith.mulf %7, %13 : vector<32x128xf32>
    %c0_6 = arith.constant 0 : index
    %c0_7 = arith.constant 0 : index
    %15 = vector.load %arg4[%c0_6, %c0_7] : memref<128x128xf32, #tpu.memory_space<vmem>>, vector<128x128xf32>
    %cst_8 = arith.constant dense<0.000000e+00> : vector<32x128xf32>
    %16 = tpu.matmul %14, %15, %cst_8 {dimension_numbers = #tpu.dot_dimension_numbers<[1], [0], [0], [1], [0, 0, 1, 1], [], []>} : vector<32x128xf32>, vector<128x128xf32>, vector<32x128xf32> -> vector<32x128xf32>
    %c0_9 = arith.constant 0 : index
    %c0_10 = arith.constant 0 : index
    %17 = vector.load %arg5[%c0_9, %c0_10] : memref<1x128xf32, #tpu.memory_space<vmem>>, vector<1x128xf32>
    %18 = vector.broadcast %17 : vector<1x128xf32> to vector<32x128xf32>
    %19 = arith.addf %16, %18 : vector<32x128xf32>
    %c0_11 = arith.constant 0 : index
    %c0_12 = arith.constant 0 : index
    %20 = vector.load %arg6[%c0_11, %c0_12] : memref<32x128xf32, #tpu.memory_space<vmem>>, vector<32x128xf32>
    tpu.vector_store %arg6[%c0_11, %c0_12], %19 {strides = array<i32>} : memref<32x128xf32, #tpu.memory_space<vmem>>, vector<32x128xf32>,
    return
  }
  func.func @transform_0(%arg0: i32) -> (i32, i32) {
    %c0_i32 = arith.constant 0 : i32
    %c0_i32_0 = arith.constant 0 : i32
    return %arg0, %c0_i32 : i32, i32
  }
  func.func @transform_1(%arg0: i32) -> (i32, i32) {
    %c0_i32 = arith.constant 0 : i32
    %c0_i32_0 = arith.constant 0 : i32
    %c0_i32_1 = arith.constant 0 : i32
    return %c0_i32, %c0_i32_0 : i32, i32
  }
  func.func @transform_2(%arg0: i32) -> (i32, i32) {
    %c0_i32 = arith.constant 0 : i32
    %c0_i32_0 = arith.constant 0 : i32
    %c0_i32_1 = arith.constant 0 : i32
    return %c0_i32, %c0_i32_0 : i32, i32
  }
  func.func @transform_3(%arg0: i32) -> (i32, i32) {
    %c0_i32 = arith.constant 0 : i32
    %c0_i32_0 = arith.constant 0 : i32
    %c0_i32_1 = arith.constant 0 : i32
    return %c0_i32, %c0_i32_0 : i32, i32
  }
  func.func @transform_4(%arg0: i32) -> (i32, i32) {
    %c0_i32 = arith.constant 0 : i32
    %c0_i32_0 = arith.constant 0 : i32
    %c0_i32_1 = arith.constant 0 : i32
    return %c0_i32, %c0_i32_0 : i32, i32
  }
  func.func @transform_5(%arg0: i32) -> (i32, i32) {
    %c0_i32 = arith.constant 0 : i32
    %c0_i32_0 = arith.constant 0 : i32
    return %arg0, %c0_i32 : i32, i32
  }
}

</mosaic_0001>

<bundles_post_ra>
// kernel: attn_net_gated_forward.1
= control target key start
LH: loop header
LB: loop body
LE: loop exit
PB: predicated region body
PF: predicated region fallthrough
CT: control target
= control target key end

     0   :  { %s750_s1 = inlined_call_operand.vmem [shape: f32[256,256], index: 1, kind: input, shape index: {}]   ;;  %s751_s0 = inlined_call_operand.vmem [shape: f32[32,256], index: 0, kind: input, shape index: {}]   ;;  %s752_s4 = inlined_call_operand.vmem [shape: f32[1,128], index: 4, kind: input, shape index: {}]   ;;  %s753_s3 = inlined_call_operand.vmem [shape: f32[128,128], index: 3, kind: input, shape index: {}]   ;;  %s754_s2 = inlined_call_operand.vmem [shape: f32[1,256], index: 2, kind: input, shape index: {}]   ;;  %s755_s5 = inlined_call_operand.vmem [shape: f32[32,128], index: 5, kind: output, shape index: {}]  }
   0x1   :  { %v59_v0 = vld [vmem:[%s750_s1 + $0xf8] sm:$0xff]  ;;  %v57_v1 = vld [vmem:[%s750_s1 + $0xe8] sm:$0xff]  ;;  %v58_v13 = vld [vmem:[%s750_s1 + $0xf0] sm:$0xff] }
   0x2   :  { %v91_v2 = vld [vmem:[%s750_s1 + $0x1f8] sm:$0xff]  ;;  %156 = vmatpush.msra.mxu2 %v59_v0  ;;  %v89_v3 = vld [vmem:[%s750_s1 + $0x1e8] sm:$0xff]  ;;  %98 = vmatpush.msra.mxu0 %v58_v13  ;;  %v56_v15 = vld [vmem:[%s750_s1 + $0xe0] sm:$0xff] }
   0x3   :  { %185 = vmatpush.msra.mxu3 %v91_v2  ;;  %v55_v4 = vld [vmem:[%s750_s1 + $0xd8] sm:$0xff]  ;;  %v53_v6 = vld [vmem:[%s750_s1 + $0xc8] sm:$0xff]  ;;  %v90_v16 = vld [vmem:[%s750_s1 + $0x1f0] sm:$0xff] }
   0x4   :  { %v87_v5 = vld [vmem:[%s750_s1 + $0x1d8] sm:$0xff]  ;;  %157 = vmatpush.msra.mxu2 %v57_v1  ;;  %v85_v7 = vld [vmem:[%s750_s1 + $0x1c8] sm:$0xff]  ;;  %v54_v17 = vld [vmem:[%s750_s1 + $0xd0] sm:$0xff]  ;;  %99 = vmatpush.msra.mxu0 %v56_v15 }
   0x5   :  { %186 = vmatpush.msra.mxu3 %v89_v3  ;;  %v51_v8 = vld [vmem:[%s750_s1 + $0xb8] sm:$0xff]  ;;  %v49_v10 = vld [vmem:[%s750_s1 + $0xa8] sm:$0xff]  ;;  %v88_v18 = vld [vmem:[%s750_s1 + $0x1e0] sm:$0xff]  ;;  %127 = vmatpush.msra.mxu1 %v90_v16 }
   0x6   :  { %158 = vmatpush.msra.mxu2 %v55_v4  ;;  %v83_v9 = vld [vmem:[%s750_s1 + $0x1b8] sm:$0xff]  ;;  %v81_v11 = vld [vmem:[%s750_s1 + $0x1a8] sm:$0xff]  ;;  %v52_v21 = vld [vmem:[%s750_s1 + $0xc0] sm:$0xff]  ;;  %100 = vmatpush.msra.mxu0 %v54_v17 }
   0x7   :  { %187 = vmatpush.msra.mxu3 %v87_v5  ;;  %v47_v12 = vld [vmem:[%s750_s1 + $0x98] sm:$0xff]  ;;  %v45_v19 = vld [vmem:[%s750_s1 + $0x88] sm:$0xff]  ;;  %v86_v22 = vld [vmem:[%s750_s1 + $0x1d0] sm:$0xff]  ;;  %128 = vmatpush.msra.mxu1 %v88_v18 }
   0x8   :  { %159 = vmatpush.msra.mxu2 %v53_v6  ;;  %v79_v14 = vld [vmem:[%s750_s1 + $0x198] sm:$0xff]  ;;  %v77_v20 = vld [vmem:[%s750_s1 + $0x188] sm:$0xff]  ;;  %v50_v25 = vld [vmem:[%s750_s1 + $0xb0] sm:$0xff]  ;;  %101 = vmatpush.msra.mxu0 %v52_v21 }
   0x9   :  { %188 = vmatpush.msra.mxu3 %v85_v7  ;;  %v43_v23 = vld [vmem:[%s750_s1 + $0x78] sm:$0xff]  ;;  %v84_v26 = vld [vmem:[%s750_s1 + $0x1c0] sm:$0xff]  ;;  %v41_v27 = vld [vmem:[%s750_s1 + $0x68] sm:$0xff]  ;;  %129 = vmatpush.msra.mxu1 %v86_v22 }
   0xa   :  { %160 = vmatpush.msra.mxu2 %v51_v8  ;;  %v75_v24 = vld [vmem:[%s750_s1 + $0x178] sm:$0xff]  ;;  %v73_v28 = vld [vmem:[%s750_s1 + $0x168] sm:$0xff]  ;;  %v48_v29 = vld [vmem:[%s750_s1 + $0xa0] sm:$0xff]  ;;  %102 = vmatpush.msra.mxu0 %v50_v25 }
   0xb   :  { %189 = vmatpush.msra.mxu3 %v83_v9  ;;  %v82_v30 = vld [vmem:[%s750_s1 + $0x1b0] sm:$0xff]  ;;  %v39_v31 = vld [vmem:[%s750_s1 + $0x58] sm:$0xff]  ;;  %130 = vmatpush.msra.mxu1 %v84_v26  ;;  %v80_v34 = vld [vmem:[%s750_s1 + $0x1a0] sm:$0xff] }
   0xc   :  { %161 = vmatpush.msra.mxu2 %v49_v10  ;;  %v71_v32 = vld [vmem:[%s750_s1 + $0x158] sm:$0xff]  ;;  %v46_v33 = vld [vmem:[%s750_s1 + $0x90] sm:$0xff]  ;;  %v37_v35 = vld [vmem:[%s750_s1 + $0x48] sm:$0xff]  ;;  %103 = vmatpush.msra.mxu0 %v48_v29 }
   0xd   :  { %190 = vmatpush.msra.mxu3 %v81_v11  ;;  %v69_v36 = vld [vmem:[%s750_s1 + $0x148] sm:$0xff]  ;;  %131 = vmatpush.msra.mxu1 %v82_v30  ;;  %v44_v37 = vld [vmem:[%s750_s1 + $0x80] sm:$0xff]  ;;  %v78_v38 = vld [vmem:[%s750_s1 + $0x190] sm:$0xff] }
   0xe   :  { %162 = vmatpush.msra.mxu2 %v47_v12  ;;  %v35_v39 = vld [vmem:[%s750_s1 + $0x38] sm:$0xff]  ;;  %104 = vmatpush.msra.mxu0 %v46_v33  ;;  %v42_v41 = vld [vmem:[%s750_s1 + $0x70] sm:$0xff]  ;;  %v76_v42 = vld [vmem:[%s750_s1 + $0x180] sm:$0xff] }
   0xf   :  { %191 = vmatpush.msra.mxu3 %v79_v14  ;;  %v67_v40 = vld [vmem:[%s750_s1 + $0x138] sm:$0xff]  ;;  %132 = vmatpush.msra.mxu1 %v80_v34  ;;  %v33_v43 = vld [vmem:[%s750_s1 + $0x28] sm:$0xff]  ;;  %v40_v45 = vld [vmem:[%s750_s1 + $0x60] sm:$0xff] }
  0x10   :  { %163 = vmatpush.msra.mxu2 %v45_v19  ;;  %v65_v44 = vld [vmem:[%s750_s1 + $0x128] sm:$0xff]  ;;  %105 = vmatpush.msra.mxu0 %v44_v37  ;;  %v74_v46 = vld [vmem:[%s750_s1 + $0x170] sm:$0xff]  ;;  %v31_v47 = vld [vmem:[%s750_s1 + $0x18] sm:$0xff] }
  0x11   :  { %192 = vmatpush.msra.mxu3 %v77_v20  ;;  %133 = vmatpush.msra.mxu1 %v78_v38  ;;  %v63_v48 = vld [vmem:[%s750_s1 + $0x118] sm:$0xff]  ;;  %v38_v49 = vld [vmem:[%s750_s1 + $0x50] sm:$0xff]  ;;  %v72_v50 = vld [vmem:[%s750_s1 + $0x160] sm:$0xff] }
  0x12   :  { %164 = vmatpush.msra.mxu2 %v43_v23  ;;  %106 = vmatpush.msra.mxu0 %v42_v41  ;;  %v29_v51 = vld [vmem:[%s750_s1 + $0x8] sm:$0xff]  ;;  %v20_v53 = vld [vmem:[%s751_s0] sm:$0xff]  ;;  %v70_v56 = vld [vmem:[%s750_s1 + $0x150] sm:$0xff] }
  0x13   :  { %193 = vmatpush.msra.mxu3 %v75_v24  ;;  %134 = vmatpush.msra.mxu1 %v76_v42  ;;  %v61_v52 = vld [vmem:[%s750_s1 + $0x108] sm:$0xff]  ;;  %v36_v55 = vld [vmem:[%s750_s1 + $0x40] sm:$0xff]  ;;  %v34_v57 = vld [vmem:[%s750_s1 + $0x30] sm:$0xff] }
  0x14   :  { %165 = vmatpush.msra.mxu2 %v41_v27  ;;  %107 = vmatpush.msra.mxu0 %v40_v45  ;;  %v21_v54 = vld [vmem:[%s751_s0 + $0x8] sm:$0xff]  ;;  %v68_v58 = vld [vmem:[%s750_s1 + $0x140] sm:$0xff]  ;;  %v66_v60 = vld [vmem:[%s750_s1 + $0x130] sm:$0xff] }
  0x15   :  { %194 = vmatpush.msra.mxu3 %v73_v28  ;;  %135 = vmatpush.msra.mxu1 %v74_v46  ;;  %v32_v59 = vld [vmem:[%s750_s1 + $0x20] sm:$0xff]  ;;  %v30_v61 = vld [vmem:[%s750_s1 + $0x10] sm:$0xff]  ;;  %v23_v0 = vld [vmem:[%s751_s0 + $0x18] sm:$0xff] }
  0x16   :  { %166 = vmatpush.msra.mxu2 %v39_v31  ;;  %108 = vmatpush.msra.mxu0 %v38_v49  ;;  %v64_v62 = vld [vmem:[%s750_s1 + $0x120] sm:$0xff]  ;;  %v22_v63 = vld [vmem:[%s751_s0 + $0x10] sm:$0xff]  ;;  %v25_v5 = vld [vmem:[%s751_s0 + $0x28] sm:$0xff] }
  0x17   :  { %195 = vmatpush.msra.mxu3 %v71_v32  ;;  %136 = vmatpush.msra.mxu1 %v72_v50  ;;  %v28_v1 = vld [vmem:[%s750_s1] sm:$0xff]  ;;  %v62_v2 = vld [vmem:[%s750_s1 + $0x110] sm:$0xff]  ;;  %v27_v7 = vld [vmem:[%s751_s0 + $0x38] sm:$0xff] }
  0x18   :  { %167 = vmatpush.msra.mxu2 %v37_v35  ;;  %109 = vmatpush.msra.mxu0 %v36_v55  ;;  %v60_v3 = vld [vmem:[%s750_s1 + $0x100] sm:$0xff]  ;;  %v26_v6 = vld [vmem:[%s751_s0 + $0x30] sm:$0xff]  ;;  %v313_v8 = vld [vmem:[%s753_s3 + $0x78] sm:$0xff] }
  0x19   :  { %196 = vmatpush.msra.mxu3 %v69_v36  ;;  %137 = vmatpush.msra.mxu1 %v70_v56  ;;  %v24_v4 = vld [vmem:[%s751_s0 + $0x20] sm:$0xff]  ;;  %v312_v9 = vld [vmem:[%s753_s3 + $0x70] sm:$0xff]  ;;  %v311_v10 = vld [vmem:[%s753_s3 + $0x68] sm:$0xff] }
  0x1a   :  { %168 = vmatpush.msra.mxu2 %v35_v39  ;;  %110 = vmatpush.msra.mxu0 %v34_v57  ;;  %v310_v11 = vld [vmem:[%s753_s3 + $0x60] sm:$0xff]  ;;  %v309_v12 = vld [vmem:[%s753_s3 + $0x58] sm:$0xff]  ;;  %v308_v13 = vld [vmem:[%s753_s3 + $0x50] sm:$0xff] }
  0x1b   :  { %197 = vmatpush.msra.mxu3 %v67_v40  ;;  %138 = vmatpush.msra.mxu1 %v68_v58  ;;  %v307_v14 = vld [vmem:[%s753_s3 + $0x48] sm:$0xff]  ;;  %v306_v15 = vld [vmem:[%s753_s3 + $0x40] sm:$0xff]  ;;  %v305_v16 = vld [vmem:[%s753_s3 + $0x38] sm:$0xff] }
  0x1c   :  { %169 = vmatpush.msra.mxu2 %v33_v43  ;;  %111 = vmatpush.msra.mxu0 %v32_v59  ;;  %v304_v17 = vld [vmem:[%s753_s3 + $0x30] sm:$0xff]  ;;  %v303_v18 = vld [vmem:[%s753_s3 + $0x28] sm:$0xff]  ;;  %v302_v19 = vld [vmem:[%s753_s3 + $0x20] sm:$0xff] }
  0x1d   :  { %198 = vmatpush.msra.mxu3 %v65_v44  ;;  %139 = vmatpush.msra.mxu1 %v66_v60  ;;  %v92_v20 = vld [vmem:[%s754_s2] sm:$0x3]  ;;  %v301_v21 = vld [vmem:[%s753_s3 + $0x18] sm:$0xff]  ;;  %v300_v23 = vld [vmem:[%s753_s3 + $0x10] sm:$0xff] }
  0x1e   :  { %170 = vmatpush.msra.mxu2 %v31_v47  ;;  %112 = vmatpush.msra.mxu0 %v30_v61  ;;  %v95_v22 = vperm.slane %v92_v20, 1  ;;  %v299_v24 = vld [vmem:[%s753_s3 + $0x8] sm:$0xff]  ;;  %v298_v28 = vld [vmem:[%s753_s3] sm:$0xff]  ;;  %v729_v35 = vperm.slane %v92_v20, 0 }
  0x1f   :  { %199 = vmatpush.msra.mxu3 %v63_v48  ;;  %140 = vmatpush.msra.mxu1 %v64_v62 }
  0x20   :  { %171 = vmatpush.msra.mxu2 %v29_v51  ;;  %113 = vmatpush.msra.mxu0 %v28_v1 }
  0x21   :  { %200 = vmatpush.msra.mxu3 %v61_v52  ;;  %172 = vmatmul.f32.vlgmr.msra.gmra.mxu2 %v20_v53 }
  0x22   :  { %201 = vmatmul.f32.vlgmr.msra.gmra.mxu3 %v21_v54  ;;  %141 = vmatpush.msra.mxu1 %v62_v2 }
  0x23   :  { %114 = vmatmul.f32.vlgmr.msra.gmra.mxu0 %v20_v53  ;;  %360 = vmatpush.msrb.mxu2 %v313_v8 }
  0x24   :  { %142 = vmatpush.msra.mxu1 %v60_v3  ;;  %318 = vmatpush.msrb.mxu0 %v313_v8 }
  0x25   :  { %143 = vmatmul.f32.vlgmr.msra.gmra.mxu1 %v21_v54  ;;  %361 = vmatpush.msrb.mxu3 %v313_v8 }
  0x26   :  { %359 = vmatpush.msrb.mxu1 %v313_v8  ;;  %319 = vmatpush.msrb.mxu0 %v312_v9 }
  0x27   :  { %363 = vmatpush.msrb.mxu2 %v312_v9  ;;  %364 = vmatpush.msrb.mxu3 %v312_v9 }
  0x28   :  { %362 = vmatpush.msrb.mxu1 %v312_v9  ;;  %320 = vmatpush.msrb.mxu0 %v311_v10 }
  0x29   :  { %175 = vmatmul.f32.gmra.mxu2 %v22_v63  ;;  %367 = vmatpush.msrb.mxu3 %v311_v10 }
  0x2a   :  { %204 = vmatmul.f32.gmra.mxu3 %v23_v0  ;;  %365 = vmatpush.msrb.mxu1 %v311_v10 }
  0x2b   :  { %117 = vmatmul.f32.gmra.mxu0 %v22_v63  ;;  %366 = vmatpush.msrb.mxu2 %v311_v10 }
  0x2c   :  { %321 = vmatpush.msrb.mxu0 %v310_v11  ;;  %368 = vmatpush.msrb.mxu1 %v310_v11 }
  0x2d   :  { %146 = vmatmul.f32.gmra.mxu1 %v23_v0  ;;  %369 = vmatpush.msrb.mxu2 %v310_v11 }
  0x2e   :  { %370 = vmatpush.msrb.mxu3 %v310_v11  ;;  %322 = vmatpush.msrb.mxu0 %v309_v12 }
  0x2f   :  { %371 = vmatpush.msrb.mxu1 %v309_v12  ;;  %372 = vmatpush.msrb.mxu2 %v309_v12 }
  0x30   :  { %373 = vmatpush.msrb.mxu3 %v309_v12  ;;  %323 = vmatpush.msrb.mxu0 %v308_v13 }
  0x31   :  { %178 = vmatmul.f32.gmra.mxu2 %v24_v4  ;;  %374 = vmatpush.msrb.mxu1 %v308_v13 }
  0x32   :  { %207 = vmatmul.f32.gmra.mxu3 %v25_v5  ;;  %375 = vmatpush.msrb.mxu2 %v308_v13 }
  0x33   :  { %120 = vmatmul.f32.gmra.mxu0 %v24_v4  ;;  %376 = vmatpush.msrb.mxu3 %v308_v13 }
  0x34   :  { %324 = vmatpush.msrb.mxu0 %v307_v14  ;;  %377 = vmatpush.msrb.mxu1 %v307_v14 }
  0x35   :  { %149 = vmatmul.f32.gmra.mxu1 %v25_v5  ;;  %378 = vmatpush.msrb.mxu2 %v307_v14 }
  0x36   :  { %379 = vmatpush.msrb.mxu3 %v307_v14  ;;  %325 = vmatpush.msrb.mxu0 %v306_v15 }
  0x37   :  { %380 = vmatpush.msrb.mxu1 %v306_v15  ;;  %381 = vmatpush.msrb.mxu2 %v306_v15 }
  0x38   :  { %382 = vmatpush.msrb.mxu3 %v306_v15  ;;  %326 = vmatpush.msrb.mxu0 %v305_v16 }
  0x39   :  { %181 = vmatmul.f32.gmra.mxu2 %v26_v6  ;;  %383 = vmatpush.msrb.mxu1 %v305_v16 }
  0x3a   :  { %210 = vmatmul.f32.gmra.mxu3 %v27_v7  ;;  %384 = vmatpush.msrb.mxu2 %v305_v16 }
  0x3b   :  { %123 = vmatmul.f32.gmra.mxu0 %v26_v6  ;;  %385 = vmatpush.msrb.mxu3 %v305_v16 }
  0x3c   :  { %327 = vmatpush.msrb.mxu0 %v304_v17  ;;  %386 = vmatpush.msrb.mxu1 %v304_v17 }
  0x3d   :  { %152 = vmatmul.f32.gmra.mxu1 %v27_v7  ;;  %387 = vmatpush.msrb.mxu2 %v304_v17 }
  0x3e   :  { %388 = vmatpush.msrb.mxu3 %v304_v17  ;;  %328 = vmatpush.msrb.mxu0 %v303_v18 }
  0x3f   :  { %389 = vmatpush.msrb.mxu1 %v303_v18  ;;  %390 = vmatpush.msrb.mxu2 %v303_v18 }
  0x40   :  { %391 = vmatpush.msrb.mxu3 %v303_v18  ;;  %329 = vmatpush.msrb.mxu0 %v302_v19 }
  0x41   :  { %392 = vmatpush.msrb.mxu1 %v302_v19  ;;  %393 = vmatpush.msrb.mxu2 %v302_v19 }
  0x42   :  { %394 = vmatpush.msrb.mxu3 %v302_v19  ;;  %330 = vmatpush.msrb.mxu0 %v301_v21 }
  0x43   :  { %395 = vmatpush.msrb.mxu1 %v301_v21  ;;  %396 = vmatpush.msrb.mxu2 %v301_v21 }
  0x44   :  { %397 = vmatpush.msrb.mxu3 %v301_v21  ;;  %331 = vmatpush.msrb.mxu0 %v300_v23 }
  0x45   :  { %398 = vmatpush.msrb.mxu1 %v300_v23  ;;  %399 = vmatpush.msrb.mxu2 %v300_v23 }
  0x46   :  { %400 = vmatpush.msrb.mxu3 %v300_v23  ;;  %332 = vmatpush.msrb.mxu0 %v299_v24 }
  0x47   :  { %401 = vmatpush.msrb.mxu1 %v299_v24  ;;  %402 = vmatpush.msrb.mxu2 %v299_v24 }
  0x48   :  { %403 = vmatpush.msrb.mxu3 %v299_v24  ;;  %333 = vmatpush.msrb.mxu0 %v298_v28 }
  0x49   :  { %404 = vmatpush.msrb.mxu1 %v298_v28  ;;  %405 = vmatpush.msrb.mxu2 %v298_v28 }
  0x4a   :  { %406 = vmatpush.msrb.mxu3 %v298_v28 }
  0xa0   :  { %v115_v31 = vpop.f32.mrf.mxu0 }
  0xa1   :  { %v116_v41 = vadd.f32 %v115_v31, %v729_v35 }
  0xa2   :  { %v144_v37 = vpop.f32.mrf.mxu1 }
  0xa3   :  { %v145_v46 = vadd.f32 %v144_v37, %v116_v41 }
  0xa4   :  { %v173_v25 = vpop.f32.mrf.mxu2 }
  0xa5   :  { %v202_v26 = vpop.f32.mrf.mxu3  ;;  %v174_v27 = vadd.f32 %v173_v25, %v95_v22 }
  0xa7   :  { %v203_v29 = vadd.f32 %v202_v26, %v174_v27 }
  0xa8   :  { %v118_v45 = vpop.f32.mrf.mxu0 }
  0xa9   :  { %v355_v30 = vmul.f32 -1.442695, %v203_v29  ;;  %v119_v53 = vadd.f32 %v118_v45, %v729_v35 }
  0xaa   :  { %v147_v50 = vpop.f32.mrf.mxu1 }
  0xab   :  { %408 = vpow2.f32 %v355_v30  ;;  %v148_v59 = vadd.f32 %v147_v50, %v119_v53 }
  0xac   :  { %v176_v32 = vpop.f32.mrf.mxu2 }
  0xad   :  { %v205_v33 = vpop.f32.mrf.mxu3  ;;  %v177_v34 = vadd.f32 %v176_v32, %v95_v22 }
  0xaf   :  { %v206_v36 = vadd.f32 %v205_v33, %v177_v34 }
  0xb0   :  { %v121_v0 = vpop.f32.mrf.mxu0 }
  0xb1   :  { %v409_v38 = vpop.eup %408  ;;  %v356_v39 = vmul.f32 -1.442695, %v206_v36  ;;  %v122_v10 = vadd.f32 %v121_v0, %v729_v35 }
  0xb2   :  { %v230_v40 = vadd.f32 1.0, %v409_v38  ;;  %v150_v11 = vpop.f32.mrf.mxu1 }
  0xb3   :  { %410 = vpow2.f32 %v356_v39  ;;  %v151_v16 = vadd.f32 %v150_v11, %v122_v10 }
  0xb4   :  { %412 = vrcp.f32 %v230_v40  ;;  %v179_v42 = vpop.f32.mrf.mxu2  ;;  %v243_v60 = vand.u32 2147483647, %v230_v40  ;;  %v245_v61 = vand.u32 2147483648, %v230_v40  ;;  %vm239_vm1 = vweird.f32 %v230_v40 }
  0xb5   :  { %v208_v43 = vpop.f32.mrf.mxu3  ;;  %v180_v44 = vadd.f32 %v179_v42, %v95_v22  ;;  %414 = vtanh.f32 %v145_v46 }
  0xb6   :  { %vm244_vm3 = vcmp.eq.f32.partialorder %v243_v60, 8.507059e+37  ;;  %v246_v7 = vor.u32 1.1754944e-38, %v245_v61 }
  0xb7   :  { %v209_v47 = vadd.f32 %v208_v43, %v180_v44 }
  0xb9   :  { %v411_v48 = vpop.eup %410  ;;  %v357_v49 = vmul.f32 -1.442695, %v209_v47 }
  0xba   :  { %v413_v51 = vpop.eup %412  ;;  %v231_v52 = vadd.f32 1.0, %v411_v48  ;;  %v153_v31 = vpop.f32.mrf.mxu1 }
  0xbb   :  { %v235_v54 = vmul.f32 %v413_v51, %v230_v40  ;;  %416 = vpow2.f32 %v357_v49  ;;  %vm240_vm0 = vweird.f32 %v413_v51  ;;  %v415_v1 = vpop.eup %414 }
  0xbc   :  { %418 = vrcp.f32 %v231_v52  ;;  %v182_v55 = vpop.f32.mrf.mxu2  ;;  %vm241_vm2 = vmor %vm239_vm1, %vm240_vm0  ;;  %v260_v15 = vand.u32 2147483648, %v231_v52  ;;  %v258_v18 = vand.u32 2147483647, %v231_v52  ;;  %vm254_vm5 = vweird.f32 %v231_v52 }
  0xbd   :  { %v211_v56 = vpop.f32.mrf.mxu3  ;;  %v183_v57 = vadd.f32 %v182_v55, %v95_v22  ;;  %v236_v58 = vsub.f32 1.0, %v235_v54  ;;  %420 = vtanh.f32 %v148_v59  ;;  %v124_v22 = vpop.f32.mrf.mxu0  ;;  %v407_v55 = vld [vmem:[%s752_s4] ss:$0 sm:$0xff] }
  0xbe   :  { %v261_v25 = vor.u32 1.1754944e-38, %v260_v15  ;;  %vm259_vm7 = vcmp.eq.f32.partialorder %v258_v18, 8.507059e+37  ;;  %v125_v29 = vadd.f32 %v124_v22, %v729_v35 }
  0xbf   :  { %v212_v62 = vadd.f32 %v211_v56, %v183_v57  ;;  %v237_v63 = vmul.f32 %v413_v51, %v236_v58 }
  0xc0   :  { %v154_v37 = vadd.f32 %v153_v31, %v125_v29 }
  0xc1   :  { %v417_v2 = vpop.eup %416  ;;  %v358_v3 = vmul.f32 -1.442695, %v212_v62  ;;  %v238_v4 = vadd.f32 %v413_v51, %v237_v63 }
  0xc2   :  { %v419_v5 = vpop.eup %418  ;;  %v232_v6 = vadd.f32 1.0, %v417_v2 }
  0xc3   :  { %v250_v8 = vmul.f32 %v419_v5, %v231_v52  ;;  %422 = vpow2.f32 %v358_v3  ;;  %v242_v9 = vsel %vm241_vm2, %v413_v51, %v238_v4  ;;  %vm255_vm4 = vweird.f32 %v419_v5  ;;  %v421_v19 = vpop.eup %420 }
  0xc4   :  { %424 = vrcp.f32 %v232_v6  ;;  %v247_v12 = vsel %vm244_vm3, %v246_v7, %v242_v9  ;;  %vm256_vm6 = vmor %vm254_vm5, %vm255_vm4  ;;  %v275_v33 = vand.u32 2147483648, %v232_v6  ;;  %v273_v36 = vand.u32 2147483647, %v232_v6 }
  0xc5   :  { %v294_v13 = vmul.f32 %v415_v1, %v247_v12  ;;  %v251_v14 = vsub.f32 1.0, %v250_v8  ;;  %426 = vtanh.f32 %v151_v16  ;;  %vm269_vm9 = vweird.f32 %v232_v6 }
  0xc6   :  { %v276_v41 = vor.u32 1.1754944e-38, %v275_v33  ;;  %vm274_vm11 = vcmp.eq.f32.partialorder %v273_v36, 8.507059e+37 }
  0xc7   :  { %334 = vmatmul.f32.vlgmr.msrb.gmra.mxu0 %v294_v13  ;;  %v252_v17 = vmul.f32 %v419_v5, %v251_v14 }
  0xc9   :  { %v423_v20 = vpop.eup %422  ;;  %v253_v21 = vadd.f32 %v419_v5, %v252_v17 }
  0xca   :  { %v425_v23 = vpop.eup %424  ;;  %v233_v24 = vadd.f32 1.0, %v423_v20 }
  0xcb   :  { %v265_v26 = vmul.f32 %v425_v23, %v232_v6  ;;  %v257_v27 = vsel %vm256_vm6, %v419_v5, %v253_v21  ;;  %vm270_vm8 = vweird.f32 %v425_v23  ;;  %v427_v38 = vpop.eup %426 }
  0xcc   :  { %428 = vrcp.f32 %v233_v24  ;;  %v262_v28 = vsel %vm259_vm7, %v261_v25, %v257_v27  ;;  %vm271_vm10 = vmor %vm269_vm9, %vm270_vm8  ;;  %v290_v46 = vand.u32 2147483648, %v233_v24  ;;  %v288_v48 = vand.u32 2147483647, %v233_v24 }
  0xcd   :  { %v295_v30 = vmul.f32 %v421_v19, %v262_v28  ;;  %v266_v32 = vsub.f32 1.0, %v265_v26  ;;  %430 = vtanh.f32 %v154_v37  ;;  %vm284_vm13 = vweird.f32 %v233_v24 }
  0xce   :  { %v291_v51 = vor.u32 1.1754944e-38, %v290_v46  ;;  %vm289_vm15 = vcmp.eq.f32.partialorder %v288_v48, 8.507059e+37 }
  0xcf   :  { %337 = vmatmul.f32.vlgmr.msrb.gmra.mxu1 %v295_v30  ;;  %v267_v34 = vmul.f32 %v425_v23, %v266_v32 }
  0xd1   :  { %v268_v39 = vadd.f32 %v425_v23, %v267_v34 }
  0xd2   :  { %v429_v40 = vpop.eup %428 }
  0xd3   :  { %v280_v42 = vmul.f32 %v429_v40, %v233_v24  ;;  %v272_v43 = vsel %vm271_vm10, %v425_v23, %v268_v39  ;;  %vm285_vm12 = vweird.f32 %v429_v40  ;;  %v431_v50 = vpop.eup %430 }
  0xd4   :  { %v277_v35 = vsel %vm274_vm11, %v276_v41, %v272_v43  ;;  %vm286_vm14 = vmor %vm284_vm13, %vm285_vm12 }
  0xd5   :  { %v296_v44 = vmul.f32 %v427_v38, %v277_v35  ;;  %v281_v45 = vsub.f32 1.0, %v280_v42 }
  0xd7   :  { %340 = vmatmul.f32.vlgmr.msrb.gmra.mxu2 %v296_v44  ;;  %v282_v47 = vmul.f32 %v429_v40, %v281_v45 }
  0xd9   :  { %v283_v49 = vadd.f32 %v429_v40, %v282_v47 }
  0xdb   :  { %v287_v52 = vsel %vm286_vm14, %v429_v40, %v283_v49 }
  0xdc   :  { %v292_v53 = vsel %vm289_vm15, %v291_v51, %v287_v52 }
  0xdd   :  { %v297_v54 = vmul.f32 %v431_v50, %v292_v53 }
  0xdf   :  { %343 = vmatmul.f32.vlgmr.msrb.gmra.mxu3 %v297_v54 }
 0x144   :  { %v335_v56 = vpop.f32.mrf.mxu0 }
 0x145   :  { %v336_v57 = vadd.f32 %v407_v55, %v335_v56 }
 0x147   :  { %347 = vst [vmem:[%s755_s5] sm:$0xff] %v336_v57 }
 0x14c   :  { %v338_v58 = vpop.f32.mrf.mxu1 }
 0x14d   :  { %v339_v59 = vadd.f32 %v407_v55, %v338_v58 }
 0x14f   :  { %348 = vst [vmem:[%s755_s5 + $0x8] sm:$0xff] %v339_v59 }
 0x15a   :  { %v341_v60 = vpop.f32.mrf.mxu2 }
 0x15b   :  { %v342_v61 = vadd.f32 %v407_v55, %v341_v60 }
 0x15d   :  { %349 = vst [vmem:[%s755_s5 + $0x10] sm:$0xff] %v342_v61 }
 0x162   :  { %v344_v62 = vpop.f32.mrf.mxu3 }
 0x163   :  { %v345_v63 = vadd.f32 %v407_v55, %v344_v62 }
 0x165   :  { %350 = vst [vmem:[%s755_s5 + $0x18] sm:$0xff] %v345_v63 }

</bundles_post_ra>
